<compile_context>
chip_gen: v5e
topology: v5e:2x2
jax: 0.10.0
libtpu: 0.0.40
codegen_flags: <defaults>
</compile_context>

<pallas_src>
import functools

import jax
import jax.numpy as jnp
from jax.experimental import pallas as pl
from jax.experimental.pallas import tpu as pltpu


# --------------------------------------------------------------------------- #
# small helpers
# --------------------------------------------------------------------------- #
def _pair(v):
    return (v, v) if isinstance(v, int) else tuple(v)


def _hashable(v):
    return tuple(v) if isinstance(v, (list, tuple)) else v


def _round_up(x, m):
    return ((x + m - 1) // m) * m


def _cdiv(a, b):
    return -(-a // b)


def _vmem_budget():
    """(vmem_limit_bytes, per-input-buffer byte budget), generation aware."""
    try:
        phys = int(pltpu.get_tpu_info().vmem_capacity_bytes)
    except Exception:
        phys = 64 * 1024 * 1024
    vmem_limit = max(32 * 1024 * 1024, min(phys // 2, 64 * 1024 * 1024))
    in_buf_budget = min(6 * 1024 * 1024, vmem_limit // 8)
    return vmem_limit, in_buf_budget


def _lane_blocks(m):
    """Padded lane width mp and candidate lane-block sizes (largest first)."""
    if m <= 128:
        return m, [m]                       # keep exact width; no lane padding
    mp = _round_up(m, 128)
    opts = [d for d in range(mp, 127, -128) if mp % d == 0]
    return mp, opts


@functools.lru_cache(maxsize=None)
def _complex_bitcast_supported():
    """Probe (once) whether complex64<->float32 bitcast is supported and has
    the expected interleaved (re, im) layout."""
    try:
        a = jnp.asarray([1.0 + 2.0j], dtype=jnp.complex64)
        b = jax.lax.bitcast_convert_type(a, jnp.float32)
        if b.shape != (1, 2):
            return False
        if not bool(jnp.allclose(b, jnp.asarray([[1.0, 2.0]], jnp.float32))):
            return False
        c = jax.lax.bitcast_convert_type(b, jnp.complex64)
        return bool(jnp.allclose(c, a))
    except Exception:
        return False


def _complex_to_reim_f32(x):
    """complex64 (...,) -> float32 (..., 2) with [..., 0]=re, [..., 1]=im."""
    if _complex_bitcast_supported():
        return jax.lax.bitcast_convert_type(x, jnp.float32)
    return jnp.stack([jnp.real(x).astype(jnp.float32),
                      jnp.imag(x).astype(jnp.float32)], axis=-1)


def _reim_f32_to_complex(x):
    """float32 (..., 2) -> complex64 (...,)."""
    if _complex_bitcast_supported():
        return jax.lax.bitcast_convert_type(x, jnp.complex64)
    return jax.lax.complex(x[..., 0], x[..., 1])


# --------------------------------------------------------------------------- #
# kernels
# --------------------------------------------------------------------------- #
def _folded_pool_kernel(x_ref, o_ref, *, kh, kw, inv_area):
    """Fast path: x_ref (toh, kh, kw, tw, tm) -> o_ref (toh, tw, tm).

    Each window term is a contiguous, lane-dense leading-axis read straight
    from the input buffer; only a single (toh, tw, tm) accumulator is live.
    """
    acc = x_ref[:, 0, 0, :, :]
    for i in range(kh):
        for j in range(kw):
            if i == 0 and j == 0:
                continue
            acc = acc + x_ref[:, i, j, :, :]
    o_ref[...] = acc * inv_area


def _strided_pool_kernel(x_ref, o_ref, *, kh, kw, sh, sw, toh, w_out, inv_area):
    """Fallback path (stride != kernel): strided window slices on a halo'd
    (tih, wp, tm) tile -> (toh, w_out, tm) output tile."""
    x = x_ref[...]
    tm = x.shape[-1]
    lim_h = sh * (toh - 1) + 1
    lim_w = sw * (w_out - 1) + 1
    acc = jax.lax.slice(x, (0, 0, 0), (lim_h, lim_w, tm), (sh, sw, 1))
    for i in range(kh):
        for j in range(kw):
            if i == 0 and j == 0:
                continue
            acc = acc + jax.lax.slice(
                x, (i, j, 0), (i + lim_h, j + lim_w, tm), (sh, sw, 1))
    o_ref[...] = acc * inv_area


# --------------------------------------------------------------------------- #
# host-side drivers
# --------------------------------------------------------------------------- #
def _pool_folded(x5, *, kh, kw, ph, pw, h_out, w_out, m, mp, tm_opts,
                 in_buf_budget, vmem_limit, inv_area):
    """stride == kernel path. x5: (n, c, h, w, 2) float32 -> (h_out, w_out, m)."""
    n, c, h, w, _ = x5.shape

    # ---- joint (tm, toh, tw) selection against the per-buffer VMEM budget ----
    tm, toh, tw, num_w = tm_opts[-1], 1, w_out, 1
    picked = False
    for cand in tm_opts:                          # largest lane block first
        row_bytes = kh * kw * w_out * cand * 4    # input bytes for one out row
        if row_bytes <= in_buf_budget:
            tm = cand
            toh = max(1, min(h_out, in_buf_budget // row_bytes))
            picked = True
            break
    if not picked:
        # Even one output row is too wide for the smallest lane block: split W.
        tm = tm_opts[-1]
        col_bytes = kh * kw * tm * 4
        tw = max(8, (in_buf_budget // col_bytes) // 8 * 8)
        tw = min(tw, _round_up(w_out, 8))
        num_w = _cdiv(w_out, tw)
        toh = 1

    num_m = mp // tm
    num_h = _cdiv(h_out, toh)
    # v7x megacore: keep at least two grid steps on a parallel axis.
    if num_h * num_w * num_m == 1 and h_out >= 2:
        toh = _cdiv(h_out, 2)
        num_h = _cdiv(h_out, toh)

    ho_pad = num_h * toh
    wo_pad = num_w * tw
    hrows = ho_pad * kh
    wcols = wo_pad * kw

    # ---- single host-side relayout: pad + fold (kh, kw) into leading axes ----
    pad_h_hi = max(0, hrows - (h + ph))
    pad_w_hi = max(0, wcols - (w + pw))
    arr = jnp.pad(x5, ((0, 0), (0, 0), (ph, pad_h_hi), (pw, pad_w_hi), (0, 0)))
    arr = arr[:, :, :hrows, :wcols, :]
    arr = (arr.reshape(n * c, ho_pad, kh, wo_pad, kw, 2)
              .transpose(1, 2, 4, 3, 0, 5)        # (ho, kh, kw, wo, nc, reim)
              .reshape(ho_pad, kh, kw, wo_pad, m))
    if mp != m:
        arr = jnp.pad(arr, ((0, 0),) * 4 + ((0, mp - m),))

    kern = functools.partial(_folded_pool_kernel, kh=kh, kw=kw, inv_area=inv_area)
    cost = pl.CostEstimate(
        flops=int(kh * kw * ho_pad * wo_pad * mp),
        transcendentals=0,
        bytes_accessed=int((ho_pad * kh * kw * wo_pad * mp
                            + ho_pad * wo_pad * mp) * 4),
    )
    out = pl.pallas_call(
        kern,
        out_shape=jax.ShapeDtypeStruct((ho_pad, wo_pad, mp), jnp.float32),
        grid=(num_h, num_w, num_m),
        in_specs=[pl.BlockSpec((toh, kh, kw, tw, tm),
                               lambda ri, wi, mi: (ri, 0, 0, wi, mi))],
        out_specs=pl.BlockSpec((toh, tw, tm), lambda ri, wi, mi: (ri, wi, mi)),
        compiler_params=pltpu.CompilerParams(
            dimension_semantics=("parallel", "parallel", "parallel"),
            vmem_limit_bytes=vmem_limit),
        cost_estimate=cost,
    )(arr)
    return out[:h_out, :w_out, :m]


def _pool_strided(x5, *, kh, kw, sh, sw, ph, pw, h_out, w_out, m, mp, tm_opts,
                  in_buf_budget, vmem_limit, inv_area):
    """stride != kernel path (halo-blocked H). Returns (h_out, w_out, m)."""
    n, c, h, w, _ = x5.shape
    wp = w + 2 * pw

    # Lane block: largest candidate for which a single output-row slab fits.
    def slab_bytes(toh, tm_):
        tih_ = (toh - 1) * sh + kh
        return (tih_ * wp + (kh * kw + 2) * toh * w_out) * tm_ * 4

    tm = tm_opts[-1]
    for cand in tm_opts:
        if slab_bytes(1, cand) <= in_buf_budget:
            tm = cand
            break
    # TODO(synk): extremely wide rows on this path may still exceed the scoped
    # VMEM limit; a W grid split is not implemented for the strided fallback.
    denom = (sh * wp + (kh * kw + 2) * w_out) * tm * 4
    base = (kh - sh) * wp * tm * 4
    toh = max(1, min(h_out, (in_buf_budget - base) // max(1, denom)))

    num_m = mp // tm
    num_h = _cdiv(h_out, toh)
    if num_h * num_m == 1 and h_out >= 2:          # v7x megacore
        toh = _cdiv(h_out, 2)
        num_h = _cdiv(h_out, toh)

    tih = (toh - 1) * sh + kh
    ho_pad = num_h * toh
    h_need = (num_h - 1) * toh * sh + tih

    planes = x5.transpose(2, 3, 0, 1, 4).reshape(h, w, m)   # (H, W, M)
    pad_h_hi = max(0, h_need - (h + ph))
    planes = jnp.pad(planes, ((ph, pad_h_hi), (pw, pw), (0, mp - m)))
    planes = planes[:h_need]

    if num_h > 1 and tih != toh * sh:
        # Materialize halo'd H blocks so every grid step sees exactly `tih`
        # consecutive rows (bounded VMEM even with overlapping windows).
        row_idx = (jnp.arange(num_h)[:, None] * (toh * sh)
                   + jnp.arange(tih)[None, :]).reshape(-1)
        planes = jnp.take(planes, row_idx, axis=0)
    # planes: (num_h * tih, wp, mp)

    kern = functools.partial(_strided_pool_kernel, kh=kh, kw=kw, sh=sh, sw=sw,
                             toh=toh, w_out=w_out, inv_area=inv_area)
    cost = pl.CostEstimate(
        flops=int(kh * kw * ho_pad * w_out * mp),
        transcendentals=0,
        bytes_accessed=int((num_h * tih * wp * mp + ho_pad * w_out * mp) * 4),
    )
    out = pl.pallas_call(
        kern,
        out_shape=jax.ShapeDtypeStruct((ho_pad, w_out, mp), jnp.float32),
        grid=(num_h, num_m),
        in_specs=[pl.BlockSpec((tih, wp, tm), lambda ri, mi: (ri, 0, mi))],
        out_specs=pl.BlockSpec((toh, w_out, tm), lambda ri, mi: (ri, 0, mi)),
        compiler_params=pltpu.CompilerParams(
            dimension_semantics=("parallel", "parallel"),
            vmem_limit_bytes=vmem_limit),
        cost_estimate=cost,
    )(planes)
    return out[:h_out, :, :m]


# --------------------------------------------------------------------------- #
# public entry point
# --------------------------------------------------------------------------- #
@functools.partial(jax.jit,
                   static_argnames=("kernel_size", "stride", "padding",
                                    "dilation", "return_indices", "ceil_mode"))
def complex_avg_pool2d(x, *, kernel_size, stride=None, padding=0, dilation=1,
                       return_indices=False, ceil_mode=False):
    """avg_pool2d(x.real) + 1j*avg_pool2d(x.imag) for a complex NCHW input.

    Zero padding is included in the divisor (count_include_pad=True).
    """
    kh, kw = _pair(kernel_size)
    sh, sw = (kh, kw) if stride is None else _pair(stride)
    ph, pw = _pair(padding)
    dh, dw = _pair(dilation)
    assert (dh, dw) == (1, 1), "dilation != 1 is not supported"
    assert not return_indices, "return_indices=True is not supported"
    assert not ceil_mode, "ceil_mode=True is not supported"

    # TODO(synk): true 3-D (NCDHW) pooling is not handled; the reference
    # complex_avg_pool2d operates on 4-D NCHW complex tensors.
    if x.dtype != jnp.complex64:
        x = x.astype(jnp.complex64)

    n, c, h, w = x.shape
    hp, wp = h + 2 * ph, w + 2 * pw
    h_out = (hp - kh) // sh + 1
    w_out = (wp - kw) // sw + 1
    assert h_out > 0 and w_out > 0, "pooling window larger than (padded) input"

    inv_area = 1.0 / float(kh * kw)
    x5 = _complex_to_reim_f32(x)                  # (n, c, h, w, 2) float32

    m = 2 * n * c
    mp, tm_opts = _lane_blocks(m)
    vmem_limit, in_buf_budget = _vmem_budget()

    common = dict(kh=kh, kw=kw, ph=ph, pw=pw, h_out=h_out, w_out=w_out,
                  m=m, mp=mp, tm_opts=tm_opts, in_buf_budget=in_buf_budget,
                  vmem_limit=vmem_limit, inv_area=inv_area)
    if kh == sh and kw == sw:
        out_f32 = _pool_folded(x5, **common)
    else:
        out_f32 = _pool_strided(x5, sh=sh, sw=sw, **common)

    out = (out_f32.reshape(h_out, w_out, n * c, 2)
           .transpose(2, 0, 1, 3)                 # (n*c, h_out, w_out, 2)
           .reshape(n, c, h_out, w_out, 2))
    return _reim_f32_to_complex(out)              # complex64 (n, c, h_out, w_out)


class ComplexAvgPool3d:
    """JAX/Pallas port of the PyTorch ComplexAvgPool3d module."""

    def __init__(self, kernel_size, stride=None, padding=0, dilation=1,
                 return_indices=False, ceil_mode=False):
        self.kernel_size = kernel_size
        self.stride = stride
        self.padding = padding
        self.dilation = dilation
        self.ceil_mode = ceil_mode
        self.return_indices = return_indices

    def __call__(self, x):
        return complex_avg_pool2d(
            x,
            kernel_size=_hashable(self.kernel_size),
            stride=_hashable(self.stride),
            padding=_hashable(self.padding),
            dilation=_hashable(self.dilation),
            ceil_mode=bool(self.ceil_mode),
            return_indices=bool(self.return_indices),
        )


# --------------------------------------------------------------------------- #
# reference + self-test
# --------------------------------------------------------------------------- #
def _reference_complex_avg_pool2d(x, kernel_size, stride=None, padding=0):
    """Pure-JAX reference (zero-pad + reduce_window mean, count_include_pad)."""
    kh, kw = _pair(kernel_size)
    sh, sw = (kh, kw) if stride is None else _pair(stride)
    ph, pw = _pair(padding)

    def pool_part(v):
        v = jnp.pad(v, ((0, 0), (0, 0), (ph, ph), (pw, pw)))
        s = jax.lax.reduce_window(
            v, 0.0, jax.lax.add,
            window_dimensions=(1, 1, kh, kw),
            window_strides=(1, 1, sh, sw),
            padding="VALID")
        return s / float(kh * kw)

    return (pool_part(jnp.real(x).astype(jnp.float32))
            + 1j * pool_part(jnp.imag(x).astype(jnp.float32))).astype(jnp.complex64)


if __name__ == "__main__":
    key = jax.random.PRNGKey(0)
    k_re, k_im = jax.random.split(key)
    n, c, h, w = 2, 4, 16, 16
    xr = jax.random.normal(k_re, (n, c, h, w), dtype=jnp.float32)
    xi = jax.random.normal(k_im, (n, c, h, w), dtype=jnp.float32)
    x = (xr + 1j * xi).astype(jnp.complex64)

    # Default module configuration (stride = kernel_size): fast folded path.
    pool = ComplexAvgPool3d(kernel_size=2)
    out = jax.block_until_ready(pool(x))
    ref = _reference_complex_avg_pool2d(x, kernel_size=2)
    assert out.shape == (n, c, h // 2, w // 2)
    assert out.dtype == jnp.complex64
    assert jnp.allclose(out.real, ref.real, atol=1e-5, rtol=1e-5)
    assert jnp.allclose(out.imag, ref.imag, atol=1e-5, rtol=1e-5)

    # Overlapping-window + padded configuration: halo-blocked strided path.
    pool2 = ComplexAvgPool3d(kernel_size=3, stride=2, padding=1)
    out2 = jax.block_until_ready(pool2(x))
    ref2 = _reference_complex_avg_pool2d(x, kernel_size=3, stride=2, padding=1)
    assert out2.shape == ref2.shape
    assert out2.dtype == jnp.complex64
    assert jnp.allclose(out2.real, ref2.real, atol=1e-5, rtol=1e-5)
    assert jnp.allclose(out2.imag, ref2.imag, atol=1e-5, rtol=1e-5)

    print("KERNEL_OK")
</pallas_src>

<mosaic_0001>
module attributes {stable_mosaic.version = 11 : i64} {
  func.func @_folded_pool_kernel(%arg0: i32, %arg1: i32, %arg2: i32, %arg3: memref<4x2x2x8x16xf32, #tpu.memory_space<vmem>>, %arg4: memref<4x8x16xf32, #tpu.memory_space<vmem>>) attributes {dimension_semantics = [#tpu.dimension_semantics<parallel>, #tpu.dimension_semantics<parallel>, #tpu.dimension_semantics<parallel>], iteration_bounds = array<i64: 2, 1, 1>, scalar_prefetch = 0 : i64, scratch_operands = 0 : i64, tpu.core_type = #tpu.core_type<tc>, window_params = [{transform_indices = @transform_0, window_bounds = array<i64: 4, 2, 2, 8, 16>}, {transform_indices = @transform_1, window_bounds = array<i64: 4, 8, 16>}]} {
    %c0 = arith.constant 0 : index
    %c0_0 = arith.constant 0 : index
    %c0_1 = arith.constant 0 : index
    %c0_2 = arith.constant 0 : index
    %c0_3 = arith.constant 0 : index
    %0 = vector.load %arg3[%c0, %c0_0, %c0_1, %c0_2, %c0_3] : memref<4x2x2x8x16xf32, #tpu.memory_space<vmem>>, vector<4x1x1x8x16xf32>
    %1 = vector.shape_cast %0 : vector<4x1x1x8x16xf32> to vector<4x8x16xf32>
    %c0_4 = arith.constant 0 : index
    %c0_5 = arith.constant 0 : index
    %c1 = arith.constant 1 : index
    %c0_6 = arith.constant 0 : index
    %c0_7 = arith.constant 0 : index
    %2 = vector.load %arg3[%c0_4, %c0_5, %c1, %c0_6, %c0_7] : memref<4x2x2x8x16xf32, #tpu.memory_space<vmem>>, vector<4x1x1x8x16xf32>
    %3 = vector.shape_cast %2 : vector<4x1x1x8x16xf32> to vector<4x8x16xf32>
    %4 = arith.addf %1, %3 : vector<4x8x16xf32>
    %c0_8 = arith.constant 0 : index
    %c1_9 = arith.constant 1 : index
    %c0_10 = arith.constant 0 : index
    %c0_11 = arith.constant 0 : index
    %c0_12 = arith.constant 0 : index
    %5 = vector.load %arg3[%c0_8, %c1_9, %c0_10, %c0_11, %c0_12] : memref<4x2x2x8x16xf32, #tpu.memory_space<vmem>>, vector<4x1x1x8x16xf32>
    %6 = vector.shape_cast %5 : vector<4x1x1x8x16xf32> to vector<4x8x16xf32>
    %7 = arith.addf %4, %6 : vector<4x8x16xf32>
    %c0_13 = arith.constant 0 : index
    %c1_14 = arith.constant 1 : index
    %c1_15 = arith.constant 1 : index
    %c0_16 = arith.constant 0 : index
    %c0_17 = arith.constant 0 : index
    %8 = vector.load %arg3[%c0_13, %c1_14, %c1_15, %c0_16, %c0_17] : memref<4x2x2x8x16xf32, #tpu.memory_space<vmem>>, vector<4x1x1x8x16xf32>
    %9 = vector.shape_cast %8 : vector<4x1x1x8x16xf32> to vector<4x8x16xf32>
    %10 = arith.addf %7, %9 : vector<4x8x16xf32>
    %cst = arith.constant 2.500000e-01 : f32
    %11 = vector.broadcast %cst : f32 to vector<4x8x16xf32>
    %12 = arith.mulf %10, %11 : vector<4x8x16xf32>
    %c0_18 = arith.constant 0 : index
    %c0_19 = arith.constant 0 : index
    %c0_20 = arith.constant 0 : index
    %13 = vector.load %arg4[%c0_18, %c0_19, %c0_20] : memref<4x8x16xf32, #tpu.memory_space<vmem>>, vector<4x8x16xf32>
    tpu.vector_store %arg4[%c0_18, %c0_19, %c0_20], %12 {strides = array<i32>} : memref<4x8x16xf32, #tpu.memory_space<vmem>>, vector<4x8x16xf32>,
    return
  }
  func.func @transform_0(%arg0: i32, %arg1: i32, %arg2: i32) -> (i32, i32, i32, i32, i32) {
    %c0_i32 = arith.constant 0 : i32
    %c0_i32_0 = arith.constant 0 : i32
    %c0_i32_1 = arith.constant 0 : i32
    return %arg0, %c0_i32, %c0_i32_0, %arg1, %arg2 : i32, i32, i32, i32, i32
  }
  func.func @transform_1(%arg0: i32, %arg1: i32, %arg2: i32) -> (i32, i32, i32) {
    %c0_i32 = arith.constant 0 : i32
    return %arg0, %arg1, %arg2 : i32, i32, i32
  }
}

</mosaic_0001>

<bundles_post_ra>
// kernel: custom-call
= control target key start
LH: loop header
LB: loop body
LE: loop exit
PB: predicated region body
PF: predicated region fallthrough
CT: control target
= control target key end

     0   :  { %2 = vsyncpa [#allocation0], 0  ;;  %s55_s0 = inlined_call_operand.hbm [shape: c64[2,4,16,16], index: 0, kind: input, shape index: {}]   ;;  %s56_s1 = inlined_call_operand.vmem [shape: f32[2,4,16,16], index: 1, kind: output, shape index: {}]  }
   0x1   :  { %s4_s8 = sshll.u32 %s55_s0, 4  ;;  %s6_s11 = sshll.u32 %s56_s1, 4  ;;  %s5_s8 = int_to_ptr.hbm [resolvable:$true] %s4_s8  ;;  %s7_s11 = int_to_ptr.vmem [resolvable:$true] %s6_s11 }
   0x2   :  { %9 = dma.hbm_to_vmem [thread:$0]  %s5_s8, 2048, %s7_s11, [#allocation0] }
   0x3   :  { %37 = dma.done.wait [#allocation0], 2048  }
   0x4   :  { %38 = vsyncadd [#allocation0], 4294965248 }
   0x5   :  { %12 = vsyncpa [#allocation0], 1 }

// kernel: custom-call.1
= control target key start
LH: loop header
LB: loop body
LE: loop exit
PB: predicated region body
PF: predicated region fallthrough
CT: control target
= control target key end

     0   :  { %s56_s0 = inlined_call_operand.hbm [shape: c64[2,4,16,16], index: 0, kind: input, shape index: {}]   ;;  %s57_s1 = inlined_call_operand.vmem [shape: f32[2,4,16,16], index: 1, kind: output, shape index: {}]  }
   0x1   :  { %s2_s8 = scalar_lea.hbm %s56_s0, 128 }
   0x2   :  { %3 = vsyncpa [#allocation0], 0  ;;  %s5_s9 = sshll.u32 %s2_s8, 4  ;;  %s7_s12 = sshll.u32 %s57_s1, 4  ;;  %s6_s9 = int_to_ptr.hbm [resolvable:$true] %s5_s9  ;;  %s8_s12 = int_to_ptr.vmem [resolvable:$true] %s7_s12 }
   0x3   :  { %10 = dma.hbm_to_vmem [thread:$0]  %s6_s9, 2048, %s8_s12, [#allocation0] }
   0x4   :  { %38 = dma.done.wait [#allocation0], 2048  }
   0x5   :  { %39 = vsyncadd [#allocation0], 4294965248 }
   0x6   :  { %13 = vsyncpa [#allocation0], 1 }

// kernel: custom-call.2
= control target key start
LH: loop header
LB: loop body
LE: loop exit
PB: predicated region body
PF: predicated region fallthrough
CT: control target
= control target key end

     0   :  { %s105_s0 = inlined_call_operand.vmem [shape: f32[2,4,8,8], index: 0, kind: input, shape index: {}]   ;;  %s106_s1 = inlined_call_operand.vmem [shape: f32[2,4,8,8], index: 1, kind: input, shape index: {}]   ;;  %s107_s2 = inlined_call_operand.hbm [shape: c64[2,4,8,8], index: 2, kind: output, shape index: {}]  }
   0x1   :  { %s3_s11 = scalar_lea.hbm %s107_s2, 64 }
   0x2   :  { %4 = vsyncpa [#allocation0], 0  ;;  %s6_s14 = sshll.u32 %s105_s0, 4  ;;  %s8_s17 = sshll.u32 %s107_s2, 4  ;;  %s7_s14 = int_to_ptr.vmem [resolvable:$true] %s6_s14  ;;  %s9_s17 = int_to_ptr.hbm [resolvable:$true] %s8_s17 }
   0x3   :  { %11 = dma.vmem_to_hbm [thread:$0]  %s7_s14, 1024, %s9_s17, [#allocation0] }
   0x4   :  { %74 = dma.done.wait [#allocation0], 1024  }
   0x5   :  { %75 = vsyncadd [#allocation0], 4294966272 }
   0x6   :  { %14 = vsyncpa [#allocation0], 1 }
   0x7   :  { %15 = vsyncpa [#allocation1], 0  ;;  %s17_s20 = sshll.u32 %s106_s1, 4  ;;  %s19_s21 = sshll.u32 %s3_s11, 4  ;;  %s18_s20 = int_to_ptr.vmem [resolvable:$true] %s17_s20  ;;  %s20_s21 = int_to_ptr.hbm [resolvable:$true] %s19_s21 }
   0x8   :  { %22 = dma.vmem_to_hbm [thread:$0]  %s18_s20, 1024, %s20_s21, [#allocation1] }
   0x9   :  { %76 = dma.done.wait [#allocation1], 1024  }
   0xa   :  { %77 = vsyncadd [#allocation1], 4294966272 }
   0xb   :  { %25 = vsyncpa [#allocation1], 1 }

// kernel: complex_avg_pool2d.1
= control target key start
LH: loop header
LB: loop body
LE: loop exit
PB: predicated region body
PF: predicated region fallthrough
CT: control target
= control target key end

     0   :  { %s400_s6 = smov 0   ;;  %s402_s7 = smov 0   ;;  %s433_s0 = inlined_call_operand.vmem [shape: f32[8,2,2,8,16], index: 0, kind: input, shape index: {}]   ;;  %s434_s1 = inlined_call_operand.vmem [shape: f32[8,8,16], index: 1, kind: output, shape index: {}]  }
   0x1   :  { %s404_s8 = smov 0  }
   0x2 LB: > { %s30_s9 = sadd.s32 1, %s384_s7  ;;  %p321_p0 = scmp.ge.s32.totalorder %s388_s8, 1  ;;  %s388_s8 = sphi %s404_s8, %s11_s8   ;;  %s384_s7 = sphi %s402_s7, %s436_s7   ;;  %s380_s6 = sphi %s400_s6, %s435_s6  }
   0x3   : > { %p32_p1 = scmp.ge.s32.totalorder %s30_s9, 2  ;;  %p122_p2 = scmp.lt.s32.totalorder %s388_s8, 3 }
   0x5   : > { %s438_s9 = smov (%p32_p1, %s30_s9), 0  ;;  %p123_p3 = pnand %p321_p0, %p122_p2 }
   0x6   : > { %s322_s10 = sshll.u32 (!%p123_p3), %s380_s6, 2 }
   0x7   : > { %126 = sbr.rel (%p123_p3) target bundleno = 29 (0x1d), region = 24  ;;  %p156_p4 = scmp.lt.s32.totalorder (!%p123_p3), %s322_s10, 7 }
   0xc   : > { %s440_s10 = smov (!%p156_p4, %s322_s10), 7  ;;  %vm215_vm0 = vcmask 130048  }
   0xd   : > { %s341_s11 = sshll.u32 %s440_s10, 5  ;;  %s326_s15 = sshll.u32 %s440_s10, 3 }
   0xe   : > { %s166_s14 = scalar_lea.vmem %s433_s0, %s341_s11  ;;  %s178_s18 = scalar_lea.vmem %s434_s1, %s326_s15 }
   0xf   : > { %v180_v0 = vld [vmem:[%s166_s14] sm:$0xff]  ;;  %v327_v1 = vld [vmem:[%s166_s14 + $0x8] sm:$0xff]  ;;  %v331_v2 = vld [vmem:[%s166_s14 + $0x10] sm:$0xff] }
  0x10   : > { %v189_v3 = vadd.f32 %v327_v1, %v180_v0  ;;  %v181_v4 = vld [vmem:[%s166_s14 + $0x20] sm:$0xff]  ;;  %v328_v5 = vld [vmem:[%s166_s14 + $0x28] sm:$0xff]  ;;  %v335_v6 = vld [vmem:[%s166_s14 + $0x18] sm:$0xff] }
  0x11   : > { %v190_v7 = vadd.f32 %v328_v5, %v181_v4  ;;  %v332_v8 = vld [vmem:[%s166_s14 + $0x30] sm:$0xff]  ;;  %v182_v9 = vld [vmem:[%s166_s14 + $0x40] sm:$0xff]  ;;  %v336_v11 = vld [vmem:[%s166_s14 + $0x38] sm:$0xff] }
  0x12   : > { %v198_v10 = vadd.f32 %v331_v2, %v189_v3  ;;  %v329_v12 = vld [vmem:[%s166_s14 + $0x48] sm:$0xff]  ;;  %v333_v13 = vld [vmem:[%s166_s14 + $0x50] sm:$0xff]  ;;  %v183_v16 = vld [vmem:[%s166_s14 + $0x60] sm:$0xff] }
  0x13   : > { %v199_v14 = vadd.f32 %v332_v8, %v190_v7  ;;  %v191_v15 = vadd.f32 %v329_v12, %v182_v9  ;;  %v330_v17 = vld [vmem:[%s166_s14 + $0x68] sm:$0xff]  ;;  %v334_v18 = vld [vmem:[%s166_s14 + $0x70] sm:$0xff]  ;;  %v337_v20 = vld [vmem:[%s166_s14 + $0x58] sm:$0xff] }
  0x14   : > { %v207_v19 = vadd.f32 %v335_v6, %v198_v10  ;;  %v192_v21 = vadd.f32 %v330_v17, %v183_v16  ;;  %v338_v24 = vld [vmem:[%s166_s14 + $0x78] sm:$0xff] }
  0x15   : > { %v208_v22 = vadd.f32 %v336_v11, %v199_v14  ;;  %v200_v23 = vadd.f32 %v333_v13, %v191_v15 }
  0x16   : > { %v211_v25 = vmul.f32 0.25, %v207_v19  ;;  %v201_v26 = vadd.f32 %v334_v18, %v192_v21 }
  0x17   : > { %v212_v27 = vmul.f32 0.25, %v208_v22  ;;  %v209_v28 = vadd.f32 %v337_v20, %v200_v23 }
  0x18   : > { %216 = vst.msk [vmem:[%s178_s18] sm:$0xff] %vm215_vm0, %v211_v25  ;;  %v210_v29 = vadd.f32 %v338_v24, %v201_v26 }
  0x19   : > { %217 = vst.msk [vmem:[%s178_s18 + $0x8] sm:$0xff] %vm215_vm0, %v212_v27  ;;  %v213_v30 = vmul.f32 0.25, %v209_v28 }
  0x1a   : > { %v214_v31 = vmul.f32 0.25, %v210_v29 }
  0x1b   : > { %218 = vst.msk [vmem:[%s178_s18 + $0x10] sm:$0xff] %vm215_vm0, %v213_v30 }
  0x1c   : > { %219 = vst.msk [vmem:[%s178_s18 + $0x18] sm:$0xff] %vm215_vm0, %v214_v31 }
  0x1d PF: > { %s11_s8 = sadd.s32 1, %s388_s8   ;;  %s435_s6 = smov %s384_s7 }
  0x1e   : > { %p8_p5 = scmp.ge.s32.totalorder %s11_s8, 4   ;;  %s436_s7 = smov %s438_s9 }
  0x20   :  { %10 = sbr.rel (!%p8_p5) target bundleno = 2 (0x2), region = 57 }

</bundles_post_ra>
